<compile_context>
chip_gen: v7x
topology: tpu7x:2x2x1
jax: 0.10.0
libtpu: 0.0.40
codegen_flags: <defaults>
</compile_context>

<pallas_src>
import numpy as np
import jax
import jax.numpy as jnp
from jax.experimental import pallas as pl
from jax.experimental.pallas import tpu as pltpu


MAXN = 16               # padded atoms per system (MAXN*MAXN = 256 -> lane dense)
MAXN2 = MAXN * MAXN
PAD_POS = 1.0e6         # base padding coordinate for unused atom slots
BIG = 1.0e30            # additive bias that kills diagonal / lower-triangle pairs
MAX_S_BLK = 1024        # max systems per grid step (VMEM-safe on v5e/v6e/v7x)


def _round_up(x, m):
    return ((x + m - 1) // m) * m


def _choose_s_blk(S):
    """Pick the per-step system block size.

    Multiple of 32 (int8 output sublane tiling).  For batches larger than one
    tiny block we guarantee >= 2 grid steps (keeps both v7x TensorCores busy on
    the "parallel" axis) and cap at MAX_S_BLK so the f32 intermediates
    (s_blk*256*4 B each) plus double-buffered I/O stay inside the scoped VMEM
    budget on every generation (v5e 16 MiB default, v7x 64 MiB physical).
    """
    s32 = _round_up(max(int(S), 1), 32)
    if s32 <= 64:
        return s32
    return min(MAX_S_BLK, _round_up((s32 + 1) // 2, 32))


def _selection_constants():
    """Selection-difference matrix D (16x256) and static triangle bias (1x256).

    D[m, k] = [i(k) == m] - [j(k) == m]  with flat pair index k = i*MAXN + j,
    so pos_row @ D gives the per-pair coordinate difference directly in the
    lane-dense flattened layout.  bias[k] = BIG for i >= j (diagonal / lower
    triangle), 0 otherwise.
    """
    k = np.arange(MAXN2)
    ki = k // MAXN
    kj = k % MAXN
    m = np.arange(MAXN)[:, None]
    dmat = ((ki[None, :] == m).astype(np.float32)
            - ((kj[None, :] == m).astype(np.float32)))
    bias = np.where(ki < kj, 0.0, BIG).astype(np.float32)[None, :]
    return dmat, bias


def _pad_slot_values():
    """Distinct large pad coordinate per atom slot -> pad-pad pairs also get
    huge d2 (required because the runtime n_atoms test was removed)."""
    return (PAD_POS * (np.arange(MAXN, dtype=np.float32) + 1.0))


# --------------------------------------------------------------------------
# Pallas kernel: pairwise squared distances + bit-packed cutoff mask
# --------------------------------------------------------------------------
def _make_nl_mask_kernel(cut2, n_cut, s_blk):
    """cut2: tuple of python floats (cutoff^2), baked into the kernel."""

    def kernel(pos_ref, dmat_ref, bias_ref, mask_ref):
        # pos_ref:  (3*s_blk, MAXN) f32   rows [x-block; y-block; z-block]
        # dmat_ref: (MAXN, 256)     f32   constant selection-difference matrix
        # bias_ref: (1, 256)        f32   constant i<j triangle bias
        # mask_ref: (s_blk, 256)    i8    bit c set <=> pair inside cutoff[c]
        hp = jax.lax.Precision.HIGHEST   # keep f32-exact (0/+-1 weights)
        diff = jnp.dot(pos_ref[...], dmat_ref[...], precision=hp,
                       preferred_element_type=jnp.float32)   # (3*s_blk, 256)
        sq = diff * diff
        d2 = (sq[0:s_blk]
              + sq[s_blk:2 * s_blk]
              + sq[2 * s_blk:3 * s_blk]
              + bias_ref[...])                                # (s_blk, 256)

        bits = (d2 < cut2[0]).astype(jnp.int32)
        for c in range(1, n_cut):                             # static unroll
            bits = bits + (d2 < cut2[c]).astype(jnp.int32) * (1 << c)
        mask_ref[...] = bits.astype(jnp.int8)

    return kernel


def pairwise_cutoff_mask(pos_cmaj, cutoffs, s_blk=None):
    """pos_cmaj: (3, S, MAXN) f32 (unused slots pre-filled with the distinct
    pad-slot values); cutoffs: sequence of floats (<= 7 of them).

    Returns an int8 array of shape (S_pad, MAXN*MAXN): bit c of entry
    [s, i*MAXN + j] is 1 iff i < j < n_atoms[s] and |r_i - r_j| < cutoffs[c].
    """
    n_cut = len(cutoffs)
    assert 1 <= n_cut <= 7, "bit-packed int8 mask supports up to 7 cutoffs"
    S = int(pos_cmaj.shape[1])
    if s_blk is None:
        s_blk = _choose_s_blk(S)
    s_pad = _round_up(S, s_blk)
    n_blk = s_pad // s_blk

    pad_slots = jnp.asarray(_pad_slot_values())
    if s_pad != S:
        pad_block = jnp.broadcast_to(pad_slots, (3, s_pad - S, MAXN))
        pos_cmaj = jnp.concatenate([pos_cmaj, pad_block], axis=1)

    # Pack so each grid block is [x; y; z] rows of its own systems; this keeps
    # the kernel to a single fused MXU dot with no in-kernel reshape.
    pos_packed = (pos_cmaj.reshape(3, n_blk, s_blk, MAXN)
                  .transpose(1, 0, 2, 3)
                  .reshape(n_blk * 3 * s_blk, MAXN))

    cut2 = tuple(float(c) * float(c) for c in cutoffs)
    dmat, bias = _selection_constants()
    kernel = _make_nl_mask_kernel(cut2, n_cut, s_blk)

    return pl.pallas_call(
        kernel,
        grid=(n_blk,),
        in_specs=[
            pl.BlockSpec((3 * s_blk, MAXN), lambda i: (i, 0)),
            pl.BlockSpec((MAXN, MAXN2), lambda i: (0, 0)),   # resident constant
            pl.BlockSpec((1, MAXN2), lambda i: (0, 0)),      # resident constant
        ],
        out_specs=pl.BlockSpec((s_blk, MAXN2), lambda i: (i, 0)),
        out_shape=jax.ShapeDtypeStruct((s_pad, MAXN2), jnp.int8),
        compiler_params=pltpu.CompilerParams(
            dimension_semantics=("parallel",),
            vmem_limit_bytes=32 * 1024 * 1024),
    )(pos_packed, jnp.asarray(dmat), jnp.asarray(bias))


# --------------------------------------------------------------------------
# Module wrapper (mirrors TorchNeighborListRangeSeparated semantics)
# --------------------------------------------------------------------------
class NeighborListRangeSeparated:
    def __init__(self, cutoff):
        if np.isscalar(cutoff):
            cutoff = [cutoff]
        self.cutoff = np.asarray(cutoff, dtype=np.float32)
        self.max_cutoff = float(np.max(self.cutoff))

    def __call__(self, coll_batch, atomic_numbers_cumsum=None):
        atomic_numbers = np.asarray(coll_batch['atomic_numbers'])
        positions = np.asarray(coll_batch['positions'], dtype=np.float32)
        pbc = np.asarray(coll_batch['pbc'])
        atoms_number = np.asarray(coll_batch['atoms_number'])

        if coll_batch.get('sys_i') is None:
            sys_i = np.zeros_like(atomic_numbers)
        else:
            sys_i = np.asarray(coll_batch['sys_i'])

        if atoms_number.ndim:
            if atomic_numbers_cumsum is None:
                atomic_numbers_cumsum = np.concatenate(
                    [np.zeros((1,), dtype=sys_i.dtype),
                     np.cumsum(atoms_number[:-1])]).astype(sys_i.dtype)
        else:
            atomic_numbers_cumsum = np.zeros((1,), dtype=sys_i.dtype)
            sys_i = np.zeros_like(atomic_numbers)
            atoms_number = np.asarray([atoms_number], dtype=np.int32)
            pbc = pbc[None, ...]

        # TODO(synk): PBC shift enumeration (_get_shifts) is data-dependent in
        # size and not implemented in the kernel; only pbc=False is supported.
        assert not np.any(pbc), "PBC path not supported in this Pallas port"

        S = len(atomic_numbers_cumsum)
        C = len(self.cutoff)
        cum = np.asarray(atomic_numbers_cumsum, dtype=np.int64)
        sys64 = sys_i.astype(np.int64)

        n_atoms = np.bincount(sys64, minlength=S)
        assert (n_atoms.max() if n_atoms.size else 0) <= MAXN, \
            "increase MAXN (padded atoms per system)"

        # Vectorized per-system packing (atoms grouped contiguously per system,
        # as the original module's cumulative-offset indexing already assumes).
        local = np.arange(sys64.shape[0], dtype=np.int64) - cum[sys64]
        pos_cmaj = np.broadcast_to(_pad_slot_values(), (3, S, MAXN)).copy()
        pos_cmaj[:, sys64, local] = positions.T.astype(np.float32)

        # --- Pallas kernel: bit-packed cutoff membership mask ----------------
        packed = np.asarray(
            jax.block_until_ready(
                pairwise_cutoff_mask(jnp.asarray(pos_cmaj), self.cutoff)))
        packed = packed[:S].astype(np.uint8).reshape(S, MAXN, MAXN)

        # --- host-side pair extraction (dynamic-shape glue, vectorized) ------
        # TODO(synk): torch.nonzero / argsort / cat are data-dependent in
        # shape, so this glue stays on the host using the kernel's mask output.
        idcs_i, idcs_j, offsets = [], [], []
        for c in range(C):
            m = ((packed >> c) & 1).astype(bool)            # (S, MAXN, MAXN), i<j
            # Directed layout reproducing cat((pi,pj)) / cat((pj,pi)) followed
            # by a stable per-system sort on the center atom index: for center
            # a the keys 0..MAXN-1 are neighbors j>a, keys MAXN..2*MAXN-1 are
            # neighbors i<a; C-order np.nonzero gives exactly that ordering.
            directed = np.concatenate([m, m.transpose(0, 2, 1)], axis=2)
            s_idx, center, key = np.nonzero(directed)
            nbr = key % MAXN
            sys_idx_i = (center + cum[s_idx]).astype(atomic_numbers.dtype)
            sys_idx_j = (nbr + cum[s_idx]).astype(atomic_numbers.dtype)
            idcs_i.append(sys_idx_i)
            idcs_j.append(sys_idx_j)
            # no PBC -> shifts are all zero; mm(zeros, cell) == zeros
            offsets.append(np.zeros((sys_idx_i.shape[0], 3),
                                    dtype=positions.dtype))

        coll_batch['idx_i'] = idcs_i[0]
        coll_batch['idx_j'] = idcs_j[0]
        coll_batch['pbc_offset_ij'] = offsets[0]
        if len(idcs_i) > 1:
            coll_batch['idx_u'] = idcs_i[1]
            coll_batch['idx_v'] = idcs_j[1]
            coll_batch['pbc_offset_uv'] = offsets[1]
        if len(idcs_i) > 2:
            coll_batch['idcs_k'] = list(idcs_i)
            coll_batch['idcs_l'] = list(idcs_j)
            coll_batch['pbc_offsets_l'] = list(offsets)
        return coll_batch


# --------------------------------------------------------------------------
# main
# --------------------------------------------------------------------------
if __name__ == "__main__":
    key = jax.random.PRNGKey(0)
    atoms_number = np.array([6, 5], dtype=np.int32)   # two systems, 11 atoms
    n_total = int(np.sum(atoms_number))

    kpos, kz = jax.random.split(key)
    positions = jax.random.uniform(kpos, (n_total, 3),
                                   minval=0.0, maxval=3.5, dtype=jnp.float32)
    atomic_numbers = jax.random.randint(kz, (n_total,), 1, 9, dtype=jnp.int32)
    sys_i = np.array([0] * 6 + [1] * 5, dtype=np.int32)

    coll_batch = {
        'atomic_numbers': np.asarray(atomic_numbers),
        'positions': np.asarray(positions),
        'cell': np.zeros((2, 3, 3), dtype=np.float32),
        'pbc': np.zeros((2, 3), dtype=bool),
        'sys_i': sys_i,
        'atoms_number': atoms_number,
    }

    nl = NeighborListRangeSeparated([2.0, 4.0])
    out = nl(coll_batch)

    # ---- reference check (brute force, numpy) ------------------------------
    pos_np = np.asarray(positions)
    cumsum = np.concatenate([[0], np.cumsum(atoms_number[:-1])])
    for c, (ki_key, kj_key) in enumerate([('idx_i', 'idx_j'),
                                          ('idx_u', 'idx_v')]):
        ref_i, ref_j = [], []
        for s in range(len(atoms_number)):
            off = int(cumsum[s])
            n = int(atoms_number[s])
            p = pos_np[off:off + n]
            d2 = np.sum((p[:, None, :] - p[None, :, :]) ** 2, axis=-1)
            iu, ju = np.triu_indices(n, k=1)
            sel = d2[iu, ju] < nl.cutoff[c] ** 2
            pi, pj = iu[sel], ju[sel]
            bi_i = np.concatenate([pi, pj])
            bi_j = np.concatenate([pj, pi])
            order = np.argsort(bi_i, kind='stable')
            ref_i.append(bi_i[order] + off)
            ref_j.append(bi_j[order] + off)
        ref_i = np.concatenate(ref_i)
        ref_j = np.concatenate(ref_j)
        assert np.array_equal(out[ki_key], ref_i), f"mismatch in {ki_key}"
        assert np.array_equal(out[kj_key], ref_j), f"mismatch in {kj_key}"
    assert out['pbc_offset_ij'].shape == (out['idx_i'].shape[0], 3)
    assert out['pbc_offset_uv'].shape == (out['idx_u'].shape[0], 3)

    print("KERNEL_OK")
</pallas_src>

<mosaic_0001>
module attributes {stable_mosaic.version = 11 : i64} {
  func.func @kernel(%arg0: i32, %arg1: memref<96x16xf32, #tpu.memory_space<vmem>>, %arg2: memref<16x256xf32, #tpu.memory_space<vmem>>, %arg3: memref<1x256xf32, #tpu.memory_space<vmem>>, %arg4: memref<32x256xi8, #tpu.memory_space<vmem>>) attributes {dimension_semantics = [#tpu.dimension_semantics<parallel>], iteration_bounds = array<i64: 1>, scalar_prefetch = 0 : i64, scratch_operands = 0 : i64, tpu.core_type = #tpu.core_type<tc>, window_params = [{transform_indices = @transform_0, window_bounds = array<i64: 96, 16>}, {pipeline_mode = #tpu.pipeline_mode<synchronous>, transform_indices = @transform_1, window_bounds = array<i64: 16, 256>}, {pipeline_mode = #tpu.pipeline_mode<synchronous>, transform_indices = @transform_2, window_bounds = array<i64: 1, 256>}, {transform_indices = @transform_3, window_bounds = array<i64: 32, 256>}]} {
    %c0 = arith.constant 0 : index
    %c0_0 = arith.constant 0 : index
    %0 = vector.load %arg1[%c0, %c0_0] : memref<96x16xf32, #tpu.memory_space<vmem>>, vector<96x16xf32>
    %c0_1 = arith.constant 0 : index
    %c0_2 = arith.constant 0 : index
    %1 = vector.load %arg2[%c0_1, %c0_2] : memref<16x256xf32, #tpu.memory_space<vmem>>, vector<16x256xf32>
    %cst = arith.constant dense<0.000000e+00> : vector<96x256xf32>
    %2 = tpu.matmul %0, %1, %cst {dimension_numbers = #tpu.dot_dimension_numbers<[1], [0], [0], [1], [0, 0, 1, 1], [], []>, precision = #tpu.contract_precision<fp32>} : vector<96x16xf32>, vector<16x256xf32>, vector<96x256xf32> -> vector<96x256xf32>
    %3 = arith.mulf %2, %2 : vector<96x256xf32>
    %4 = vector.extract_strided_slice %3 {offsets = [0, 0], sizes = [32, 256], strides = [1, 1]} : vector<96x256xf32> to vector<32x256xf32>
    %5 = vector.extract_strided_slice %3 {offsets = [32, 0], sizes = [32, 256], strides = [1, 1]} : vector<96x256xf32> to vector<32x256xf32>
    %6 = arith.addf %4, %5 : vector<32x256xf32>
    %7 = vector.extract_strided_slice %3 {offsets = [64, 0], sizes = [32, 256], strides = [1, 1]} : vector<96x256xf32> to vector<32x256xf32>
    %8 = arith.addf %6, %7 : vector<32x256xf32>
    %c0_3 = arith.constant 0 : index
    %c0_4 = arith.constant 0 : index
    %9 = vector.load %arg3[%c0_3, %c0_4] : memref<1x256xf32, #tpu.memory_space<vmem>>, vector<1x256xf32>
    %10 = vector.broadcast %9 : vector<1x256xf32> to vector<32x256xf32>
    %11 = arith.addf %8, %10 : vector<32x256xf32>
    %cst_5 = arith.constant 4.000000e+00 : f32
    %12 = vector.broadcast %cst_5 : f32 to vector<32x256xf32>
    %13 = arith.cmpf olt, %11, %12 : vector<32x256xf32>
    %14 = arith.extui %13 : vector<32x256xi1> to vector<32x256xi32>
    %cst_6 = arith.constant 1.600000e+01 : f32
    %15 = vector.broadcast %cst_6 : f32 to vector<32x256xf32>
    %16 = arith.cmpf olt, %11, %15 : vector<32x256xf32>
    %17 = arith.extui %16 : vector<32x256xi1> to vector<32x256xi32>
    %c2_i32 = arith.constant 2 : i32
    %18 = vector.broadcast %c2_i32 : i32 to vector<32x256xi32>
    %19 = arith.muli %17, %18 : vector<32x256xi32>
    %20 = arith.addi %14, %19 : vector<32x256xi32>
    %21 = arith.trunci %20 : vector<32x256xi32> to vector<32x256xi8>
    %c0_7 = arith.constant 0 : index
    %c0_8 = arith.constant 0 : index
    %22 = vector.load %arg4[%c0_7, %c0_8] : memref<32x256xi8, #tpu.memory_space<vmem>>, vector<32x256xi8>
    tpu.vector_store %arg4[%c0_7, %c0_8], %21 {strides = array<i32>} : memref<32x256xi8, #tpu.memory_space<vmem>>, vector<32x256xi8>,
    return
  }
  func.func @transform_0(%arg0: i32) -> (i32, i32) {
    %c0_i32 = arith.constant 0 : i32
    %c0_i32_0 = arith.constant 0 : i32
    return %arg0, %c0_i32 : i32, i32
  }
  func.func @transform_1(%arg0: i32) -> (i32, i32) {
    %c0_i32 = arith.constant 0 : i32
    %c0_i32_0 = arith.constant 0 : i32
    %c0_i32_1 = arith.constant 0 : i32
    return %c0_i32, %c0_i32_0 : i32, i32
  }
  func.func @transform_2(%arg0: i32) -> (i32, i32) {
    %c0_i32 = arith.constant 0 : i32
    %c0_i32_0 = arith.constant 0 : i32
    %c0_i32_1 = arith.constant 0 : i32
    return %c0_i32, %c0_i32_0 : i32, i32
  }
  func.func @transform_3(%arg0: i32) -> (i32, i32) {
    %c0_i32 = arith.constant 0 : i32
    %c0_i32_0 = arith.constant 0 : i32
    return %arg0, %c0_i32 : i32, i32
  }
}

</mosaic_0001>

<bundles_post_ra>
// kernel: tpu_custom_call.1
= control target key start
LH: loop header
LB: loop body
LE: loop exit
PB: predicated region body
PF: predicated region fallthrough
CT: control target
= control target key end

     0   :  { %vm31_vm0 = vcmask 130048   ;;  %v1399_v7 = vmov 0.0   ;;  %s1757_s0 = inlined_call_operand.vmem [shape: f32[96,16], index: 0, kind: input, shape index: {}]   ;;  %s1758_s1 = inlined_call_operand.vmem [shape: f32[16,256], index: 1, kind: input, shape index: {}]   ;;  %s1759_s2 = inlined_call_operand.vmem [shape: f32[1,256], index: 2, kind: input, shape index: {}]   ;;  %s1760_s3 = inlined_call_operand.hbm [shape: s8[32,256], index: 3, kind: output, shape index: {}]  }
   0x1   :  { %v28_v0 = vld [vmem:[%s1758_s1 + $0x8] sm:$0xff]  ;;  %v30_v1 = vld [vmem:[%s1758_s1 + $0x18] sm:$0xff]  ;;  %v27_v2 = vld [vmem:[%s1758_s1] sm:$0xff]  ;;  %675 = vmatprep.mubr.f32.mxu0 %v1399_v7  ;;  %136 = vmatprep.mubr.f32.mxu1 %v1399_v7 }
   0x2   :  { %v68_v3 = vand.u32 4294901760, %v28_v0  ;;  %v72_v4 = vand.u32 4294901760, %v30_v1  ;;  %v29_v5 = vld [vmem:[%s1758_s1 + $0x10] sm:$0xff]  ;;  %v70_v6 = vand.u32 4294901760, %v27_v2  ;;  %v15_v8 = vld [vmem:[%s1757_s0] sm:$0xff]  ;;  %v16_v9 = vld [vmem:[%s1757_s0 + $0x8] sm:$0xff] }
   0x3   :  { %v74_v10 = vand.u32 4294901760, %v29_v5  ;;  %v33_v11 = vsel %vm31_vm0, %v15_v8, 0  ;;  %v36_v12 = vsel %vm31_vm0, %v16_v9, 0  ;;  %v17_v13 = vld [vmem:[%s1757_s0 + $0x10] sm:$0xff] }
   0x4   :  { %v1228_v14 = vpack.c.bf16 %v72_v4, %v68_v3  ;;  %v1447_v15 = vsub.f32 %v28_v0, %v68_v3  ;;  %v1449_v16 = vsub.f32 %v30_v1, %v72_v4  ;;  %v1451_v17 = vsub.f32 %v27_v2, %v70_v6 }
   0x5   :  { %v1453_v18 = vpack.c.bf16 %v74_v10, %v70_v6  ;;  %v1455_v19 = vsub.f32 %v29_v5, %v74_v10  ;;  %v1457_v20 = vand.u32 4294901760, %v33_v11  ;;  %v1459_v21 = vand.u32 4294901760, %v36_v12 }
   0x6   :  { %1241 = vmatprep.subr.bf16.mxu0 %v1228_v14  ;;  %1229 = vmatprep.subr.bf16.mxu1 %v1228_v14  ;;  %v271_v22 = vand.u32 4294901760, %v1447_v15  ;;  %v283_v23 = vand.u32 4294901760, %v1449_v16  ;;  %v277_v24 = vand.u32 4294901760, %v1451_v17  ;;  %v39_v25 = vsel %vm31_vm0, %v17_v13, 0 }
   0x7   :  { %1243 = vmatpush1.bf16.msra.mxu0 %v1453_v18  ;;  %1231 = vmatpush1.bf16.msra.mxu1 %v1453_v18  ;;  %v1468_v26 = vsub.f32 %v33_v11, %v1457_v20  ;;  %v1471_v27 = vsub.f32 %v36_v12, %v1459_v21  ;;  %v289_v28 = vand.u32 4294901760, %v1455_v19  ;;  %v1474_v29 = vand.u32 4294901760, %v39_v25 }
   0x8   :  { %8 = vsyncpa [#allocation3], 0  ;;  %v272_v30 = vsub.f32 %v1447_v15, %v271_v22  ;;  %v284_v31 = vsub.f32 %v1449_v16, %v283_v23  ;;  %v1244_v32 = vpack.c.bf16 %v283_v23, %v271_v22  ;;  %v278_v33 = vsub.f32 %v1451_v17, %v277_v24  ;;  %v18_v34 = vld [vmem:[%s1757_s0 + $0x18] sm:$0xff]  ;;  %v19_v39 = vld [vmem:[%s1757_s0 + $0x20] sm:$0xff] }
   0x9   :  { %v139_v35 = vand.u32 4294901760, %v1468_v26  ;;  %v150_v36 = vand.u32 4294901760, %v1471_v27  ;;  %v290_v37 = vsub.f32 %v1455_v19, %v289_v28  ;;  %v1246_v38 = vpack.c.bf16 %v289_v28, %v277_v24  ;;  %v20_v48 = vld [vmem:[%s1757_s0 + $0x28] sm:$0xff]  ;;  %v21_v53 = vld [vmem:[%s1757_s0 + $0x30] sm:$0xff]  ;;  %v22_v0 = vld [vmem:[%s1757_s0 + $0x38] sm:$0xff] }
   0xa   :  { %v273_v40 = vand.u32 4294901760, %v272_v30  ;;  %v285_v41 = vand.u32 4294901760, %v284_v31  ;;  %1245 = vmatprep.subr.bf16.mxu0 %v1244_v32  ;;  %v279_v42 = vand.u32 4294901760, %v278_v33  ;;  %v1489_v43 = vsub.f32 %v39_v25, %v1474_v29  ;;  %v23_v9 = vld [vmem:[%s1757_s0 + $0x40] sm:$0xff]  ;;  %v24_v24 = vld [vmem:[%s1757_s0 + $0x48] sm:$0xff] }
   0xb   :  { %679 = vmatmul.mubr.f32.vlgmr.msra.gmra.mrb[0].mxu0 %v139_v35  ;;  %v140_v44 = vsub.f32 %v1468_v26, %v139_v35  ;;  %v291_v45 = vand.u32 4294901760, %v290_v37  ;;  %v151_v46 = vsub.f32 %v1471_v27, %v150_v36  ;;  %v42_v47 = vsel %vm31_vm0, %v18_v34, 0 }
   0xc   :  { %684 = vmatprep.mubr.f32.mxu0 %v1399_v7  ;;  %v1232_v49 = vpack.c.bf16 %v285_v41, %v273_v40  ;;  %1247 = vmatpush1.bf16.msra.mxu0 %v1246_v38  ;;  %v161_v50 = vand.u32 4294901760, %v1489_v43  ;;  %v1499_v51 = vand.u32 4294901760, %v42_v47  ;;  %v45_v52 = vsel %vm31_vm0, %v19_v39, 0  ;;  %v26_v39 = vld [vmem:[%s1757_s0 + $0x58] sm:$0xff] }
   0xd   :  { %v141_v54 = vand.u32 4294901760, %v140_v44  ;;  %v1234_v55 = vpack.c.bf16 %v291_v45, %v279_v42  ;;  %v1505_v56 = vand.u32 4294901760, %v45_v52  ;;  %1249 = vmatprep.subr.bf16.mxu0 %v1228_v14  ;;  %v152_v57 = vand.u32 4294901760, %v151_v46 }
   0xe   :  { %1233 = vmatprep.subr.bf16.mxu1 %v1232_v49  ;;  %v1508_v58 = vsub.f32 %v42_v47, %v1499_v51  ;;  %v48_v59 = vsel %vm31_vm0, %v20_v48, 0  ;;  %v162_v60 = vsub.f32 %v1489_v43, %v161_v50  ;;  %v51_v63 = vsel %vm31_vm0, %v21_v53, 0 }
   0xf   :  { %142 = vmatmul.mubr.f32.vlgmr.msra.gmra.mrb[0].mxu1 %v141_v54  ;;  %688 = vmatmul.mubr.f32.gmra.mrb[2].mxu0 %v150_v36  ;;  %v1513_v61 = vsub.f32 %v45_v52, %v1505_v56  ;;  %v1515_v62 = vand.u32 4294901760, %v48_v59  ;;  %v1524_v2 = vand.u32 4294901760, %v51_v63  ;;  %v54_v3 = vsel %vm31_vm0, %v22_v0, 0 }
  0x10   :  { %1235 = vmatpush1.bf16.msra.mxu1 %v1234_v55  ;;  %147 = vmatprep.mubr.f32.mxu1 %v1399_v7  ;;  %v172_v1 = vand.u32 4294901760, %v1508_v58  ;;  %v163_v4 = vand.u32 4294901760, %v162_v60  ;;  %v1537_v10 = vand.u32 4294901760, %v54_v3  ;;  %v57_v11 = vsel %vm31_vm0, %v23_v9, 0 }
  0x11   :  { %693 = vmatprep.mubr.f32.mxu0 %v1399_v7  ;;  %v183_v6 = vand.u32 4294901760, %v1513_v61  ;;  %v1530_v8 = vsub.f32 %v48_v59, %v1515_v62  ;;  %v1543_v22 = vsub.f32 %v51_v63, %v1524_v2  ;;  %v1236_v23 = vpack.c.bf16 %v1449_v16, %v1447_v15  ;;  %v25_v15 = vld [vmem:[%s1757_s0 + $0x50] sm:$0xff] }
  0x12   :  { %v173_v5 = vsub.f32 %v1508_v58, %v172_v1  ;;  %v1552_v25 = vand.u32 4294901760, %v57_v11  ;;  %v1557_v32 = vsub.f32 %v54_v3, %v1537_v10  ;;  %v60_v16 = vsel %vm31_vm0, %v24_v24, 0 }
  0x13   :  { %153 = vmatmul.mubr.f32.gmra.mrb[2].mxu1 %v152_v57  ;;  %697 = vmatmul.mubr.f32.gmra.mrb[4].mxu0 %v161_v50  ;;  %v184_v13 = vsub.f32 %v1513_v61, %v183_v6  ;;  %v194_v14 = vand.u32 4294901760, %v1530_v8  ;;  %v205_v31 = vand.u32 4294901760, %v1543_v22  ;;  %v63_v34 = vsel %vm31_vm0, %v25_v15, 0 }
  0x14   :  { %158 = vmatprep.mubr.f32.mxu1 %v1399_v7  ;;  %702 = vmatprep.mubr.f32.mxu0 %v1399_v7  ;;  %v174_v12 = vand.u32 4294901760, %v173_v5  ;;  %v1566_v33 = vsub.f32 %v57_v11, %v1552_v25  ;;  %v216_v37 = vand.u32 4294901760, %v1557_v32  ;;  %v1571_v38 = vand.u32 4294901760, %v60_v16 }
  0x15   :  { %1237 = vmatprep.subr.bf16.mxu1 %v1236_v23  ;;  %v185_v28 = vand.u32 4294901760, %v184_v13  ;;  %v195_v30 = vsub.f32 %v1530_v8, %v194_v14  ;;  %v206_v36 = vsub.f32 %v1543_v22, %v205_v31  ;;  %v1578_v40 = vand.u32 4294901760, %v63_v34 }
  0x16   :  { %v217_v42 = vsub.f32 %v1557_v32, %v216_v37  ;;  %v227_v44 = vand.u32 4294901760, %v1566_v33  ;;  %v1583_v45 = vsub.f32 %v60_v16, %v1571_v38  ;;  %v66_v46 = vsel %vm31_vm0, %v26_v39, 0 }
  0x17   :  { %164 = vmatmul.mubr.f32.gmra.mrb[4].mxu1 %v163_v4  ;;  %706 = vmatmul.mubr.f32.gmra.mrb[6].mxu0 %v172_v1  ;;  %v196_v35 = vand.u32 4294901760, %v195_v30  ;;  %v207_v41 = vand.u32 4294901760, %v206_v36  ;;  %v1589_v47 = vsub.f32 %v63_v34, %v1578_v40  ;;  %v1593_v52 = vand.u32 4294901760, %v66_v46 }
  0x18   :  { %169 = vmatprep.mubr.f32.mxu1 %v1399_v7  ;;  %711 = vmatprep.mubr.f32.mxu0 %v1399_v7  ;;  %v218_v48 = vand.u32 4294901760, %v217_v42  ;;  %v228_v49 = vsub.f32 %v1566_v33, %v227_v44  ;;  %v238_v50 = vand.u32 4294901760, %v1583_v45  ;;  %v1238_v4 = vpack.c.bf16 %v1455_v19, %v1451_v17 }
  0x19   :  { %v249_v55 = vand.u32 4294901760, %v1589_v47  ;;  %v1600_v57 = vsub.f32 %v66_v46, %v1593_v52 }
  0x1a   :  { %v229_v53 = vand.u32 4294901760, %v228_v49  ;;  %v239_v54 = vsub.f32 %v1583_v45, %v238_v50 }
  0x1b   :  { %175 = vmatmul.mubr.f32.gmra.mrb[6].mxu1 %v174_v12  ;;  %715 = vmatmul.mubr.f32.gmra.mrb[8].mxu0 %v183_v6  ;;  %v250_v60 = vsub.f32 %v1589_v47, %v249_v55  ;;  %v260_v63 = vand.u32 4294901760, %v1600_v57 }
  0x1c   :  { %180 = vmatprep.mubr.f32.mxu1 %v1399_v7  ;;  %720 = vmatprep.mubr.f32.mxu0 %v1399_v7  ;;  %v240_v59 = vand.u32 4294901760, %v239_v54 }
  0x1d   :  { %v251_v0 = vand.u32 4294901760, %v250_v60  ;;  %v261_v1 = vsub.f32 %v1600_v57, %v260_v63 }
  0x1f   :  { %186 = vmatmul.mubr.f32.gmra.mrb[8].mxu1 %v185_v28  ;;  %724 = vmatmul.mubr.f32.gmra.mrb[10].mxu0 %v194_v14  ;;  %v262_v3 = vand.u32 4294901760, %v261_v1 }
  0x20   :  { %191 = vmatprep.mubr.f32.mxu1 %v1399_v7  ;;  %729 = vmatprep.mubr.f32.mxu0 %v1399_v7 }
  0x23   :  { %197 = vmatmul.mubr.f32.gmra.mrb[10].mxu1 %v196_v35  ;;  %733 = vmatmul.mubr.f32.gmra.mrb[12].mxu0 %v205_v31 }
  0x24   :  { %202 = vmatprep.mubr.f32.mxu1 %v1399_v7  ;;  %738 = vmatprep.mubr.f32.mxu0 %v1399_v7 }
  0x27   :  { %208 = vmatmul.mubr.f32.gmra.mrb[12].mxu1 %v207_v41  ;;  %742 = vmatmul.mubr.f32.gmra.mrb[14].mxu0 %v216_v37 }
  0x28   :  { %213 = vmatprep.mubr.f32.mxu1 %v1399_v7  ;;  %747 = vmatprep.mubr.f32.mxu0 %v1399_v7 }
  0x2b   :  { %219 = vmatmul.mubr.f32.gmra.mrb[14].mxu1 %v218_v48  ;;  %751 = vmatmul.mubr.f32.gmra.mrb[16].mxu0 %v227_v44 }
  0x2c   :  { %224 = vmatprep.mubr.f32.mxu1 %v1399_v7  ;;  %756 = vmatprep.mubr.f32.mxu0 %v1399_v7 }
  0x2f   :  { %230 = vmatmul.mubr.f32.gmra.mrb[16].mxu1 %v229_v53  ;;  %760 = vmatmul.mubr.f32.gmra.mrb[18].mxu0 %v238_v50 }
  0x30   :  { %235 = vmatprep.mubr.f32.mxu1 %v1399_v7  ;;  %765 = vmatprep.mubr.f32.mxu0 %v1399_v7 }
  0x33   :  { %241 = vmatmul.mubr.f32.gmra.mrb[18].mxu1 %v240_v59  ;;  %769 = vmatmul.mubr.f32.gmra.mrb[20].mxu0 %v249_v55 }
  0x34   :  { %246 = vmatprep.mubr.f32.mxu1 %v1399_v7  ;;  %774 = vmatprep.mubr.f32.mxu0 %v1399_v7 }
  0x37   :  { %252 = vmatmul.mubr.f32.gmra.mrb[20].mxu1 %v251_v0  ;;  %778 = vmatmul.mubr.f32.gmra.mrb[22].mxu0 %v260_v63 }
  0x38   :  { %257 = vmatprep.mubr.f32.mxu1 %v1399_v7  ;;  %860 = vmatprep.mubr.f32.mxu0 %v1399_v7 }
  0x3b   :  { %263 = vmatmul.mubr.f32.gmra.mrb[22].mxu1 %v262_v3  ;;  %862 = vmatmul.mubr.f32.vlgmr.msra.gmra.mrb[0].mxu0 %v1457_v20 }
  0x3c   :  { %353 = vmatprep.mubr.f32.mxu1 %v1399_v7  ;;  %867 = vmatprep.mubr.f32.mxu0 %v1399_v7 }
  0x3d   :  { %1251 = vmatpush1.bf16.msra.mxu0 %v1453_v18 }
  0x3f   :  { %355 = vmatmul.mubr.f32.vlgmr.msra.gmra.mrb[0].mxu1 %v1457_v20  ;;  %869 = vmatmul.mubr.f32.gmra.mrb[2].mxu0 %v1459_v21 }
  0x40   :  { %1239 = vmatpush1.bf16.msra.mxu1 %v1238_v4  ;;  %360 = vmatprep.mubr.f32.mxu1 %v1399_v7 }
  0x41   :  { %874 = vmatprep.mubr.f32.mxu0 %v1399_v7 }
  0x43   :  { %362 = vmatmul.mubr.f32.gmra.mrb[2].mxu1 %v1459_v21  ;;  %876 = vmatmul.mubr.f32.gmra.mrb[4].mxu0 %v1474_v29 }
  0x44   :  { %367 = vmatprep.mubr.f32.mxu1 %v1399_v7  ;;  %881 = vmatprep.mubr.f32.mxu0 %v1399_v7 }
  0x47   :  { %369 = vmatmul.mubr.f32.gmra.mrb[4].mxu1 %v1474_v29  ;;  %883 = vmatmul.mubr.f32.gmra.mrb[6].mxu0 %v1499_v51 }
  0x48   :  { %374 = vmatprep.mubr.f32.mxu1 %v1399_v7  ;;  %888 = vmatprep.mubr.f32.mxu0 %v1399_v7 }
  0x4b   :  { %376 = vmatmul.mubr.f32.gmra.mrb[6].mxu1 %v1499_v51  ;;  %890 = vmatmul.mubr.f32.gmra.mrb[8].mxu0 %v1505_v56 }
  0x4c   :  { %381 = vmatprep.mubr.f32.mxu1 %v1399_v7  ;;  %895 = vmatprep.mubr.f32.mxu0 %v1399_v7 }
  0x4f   :  { %383 = vmatmul.mubr.f32.gmra.mrb[8].mxu1 %v1505_v56  ;;  %897 = vmatmul.mubr.f32.gmra.mrb[10].mxu0 %v1515_v62 }
  0x50   :  { %388 = vmatprep.mubr.f32.mxu1 %v1399_v7  ;;  %902 = vmatprep.mubr.f32.mxu0 %v1399_v7 }
  0x53   :  { %390 = vmatmul.mubr.f32.gmra.mrb[10].mxu1 %v1515_v62  ;;  %904 = vmatmul.mubr.f32.gmra.mrb[12].mxu0 %v1524_v2 }
  0x54   :  { %395 = vmatprep.mubr.f32.mxu1 %v1399_v7  ;;  %909 = vmatprep.mubr.f32.mxu0 %v1399_v7 }
  0x57   :  { %397 = vmatmul.mubr.f32.gmra.mrb[12].mxu1 %v1524_v2  ;;  %911 = vmatmul.mubr.f32.gmra.mrb[14].mxu0 %v1537_v10 }
  0x58   :  { %402 = vmatprep.mubr.f32.mxu1 %v1399_v7  ;;  %916 = vmatprep.mubr.f32.mxu0 %v1399_v7 }
  0x5b   :  { %404 = vmatmul.mubr.f32.gmra.mrb[14].mxu1 %v1537_v10  ;;  %918 = vmatmul.mubr.f32.gmra.mrb[16].mxu0 %v1552_v25 }
  0x5c   :  { %409 = vmatprep.mubr.f32.mxu1 %v1399_v7  ;;  %923 = vmatprep.mubr.f32.mxu0 %v1399_v7 }
  0x5f   :  { %411 = vmatmul.mubr.f32.gmra.mrb[16].mxu1 %v1552_v25  ;;  %925 = vmatmul.mubr.f32.gmra.mrb[18].mxu0 %v1571_v38 }
  0x60   :  { %416 = vmatprep.mubr.f32.mxu1 %v1399_v7  ;;  %930 = vmatprep.mubr.f32.mxu0 %v1399_v7 }
  0x63   :  { %418 = vmatmul.mubr.f32.gmra.mrb[18].mxu1 %v1571_v38  ;;  %932 = vmatmul.mubr.f32.gmra.mrb[20].mxu0 %v1578_v40 }
  0x64   :  { %423 = vmatprep.mubr.f32.mxu1 %v1399_v7  ;;  %937 = vmatprep.mubr.f32.mxu0 %v1399_v7 }
  0x67   :  { %425 = vmatmul.mubr.f32.gmra.mrb[20].mxu1 %v1578_v40  ;;  %939 = vmatmul.mubr.f32.gmra.mrb[22].mxu0 %v1593_v52 }
  0x68   :  { %430 = vmatprep.mubr.f32.mxu1 %v1399_v7  ;;  %1013 = vmatprep.mubr.f32.mxu0 %v1399_v7 }
  0x6b   :  { %432 = vmatmul.mubr.f32.gmra.mrb[22].mxu1 %v1593_v52  ;;  %1015 = vmatmul.mubr.f32.vlgmr.msra.gmra.mrb[0].mxu0 %v1457_v20 }
  0x6c   :  { %510 = vmatprep.mubr.f32.mxu1 %v1399_v7  ;;  %1020 = vmatprep.mubr.f32.mxu0 %v1399_v7 }
  0x6f   :  { %513 = vmatmul.mubr.f32.vlgmr.msra.gmra.mrb[0].mxu1 %v1468_v26  ;;  %1022 = vmatmul.mubr.f32.gmra.mrb[2].mxu0 %v1459_v21 }
  0x70   :  { %518 = vmatprep.mubr.f32.mxu1 %v1399_v7  ;;  %1027 = vmatprep.mubr.f32.mxu0 %v1399_v7 }
  0x73   :  { %521 = vmatmul.mubr.f32.gmra.mrb[2].mxu1 %v1471_v27  ;;  %1029 = vmatmul.mubr.f32.gmra.mrb[4].mxu0 %v1474_v29 }
  0x74   :  { %526 = vmatprep.mubr.f32.mxu1 %v1399_v7  ;;  %1034 = vmatprep.mubr.f32.mxu0 %v1399_v7 }
  0x77   :  { %529 = vmatmul.mubr.f32.gmra.mrb[4].mxu1 %v1489_v43  ;;  %1036 = vmatmul.mubr.f32.gmra.mrb[6].mxu0 %v1499_v51 }
  0x78   :  { %534 = vmatprep.mubr.f32.mxu1 %v1399_v7  ;;  %1041 = vmatprep.mubr.f32.mxu0 %v1399_v7 }
  0x7b   :  { %537 = vmatmul.mubr.f32.gmra.mrb[6].mxu1 %v1508_v58  ;;  %1043 = vmatmul.mubr.f32.gmra.mrb[8].mxu0 %v1505_v56 }
  0x7c   :  { %542 = vmatprep.mubr.f32.mxu1 %v1399_v7  ;;  %1048 = vmatprep.mubr.f32.mxu0 %v1399_v7 }
  0x7f   :  { %545 = vmatmul.mubr.f32.gmra.mrb[8].mxu1 %v1513_v61  ;;  %1050 = vmatmul.mubr.f32.gmra.mrb[10].mxu0 %v1515_v62 }
  0x80   :  { %550 = vmatprep.mubr.f32.mxu1 %v1399_v7  ;;  %1055 = vmatprep.mubr.f32.mxu0 %v1399_v7 }
  0x83   :  { %553 = vmatmul.mubr.f32.gmra.mrb[10].mxu1 %v1530_v8  ;;  %1057 = vmatmul.mubr.f32.gmra.mrb[12].mxu0 %v1524_v2 }
  0x84   :  { %558 = vmatprep.mubr.f32.mxu1 %v1399_v7  ;;  %1062 = vmatprep.mubr.f32.mxu0 %v1399_v7 }
  0x87   :  { %561 = vmatmul.mubr.f32.gmra.mrb[12].mxu1 %v1543_v22  ;;  %1064 = vmatmul.mubr.f32.gmra.mrb[14].mxu0 %v1537_v10 }
  0x88   :  { %566 = vmatprep.mubr.f32.mxu1 %v1399_v7  ;;  %1069 = vmatprep.mubr.f32.mxu0 %v1399_v7 }
  0x8b   :  { %569 = vmatmul.mubr.f32.gmra.mrb[14].mxu1 %v1557_v32  ;;  %1071 = vmatmul.mubr.f32.gmra.mrb[16].mxu0 %v1552_v25 }
  0x8c   :  { %574 = vmatprep.mubr.f32.mxu1 %v1399_v7  ;;  %1076 = vmatprep.mubr.f32.mxu0 %v1399_v7 }
  0x8f   :  { %577 = vmatmul.mubr.f32.gmra.mrb[16].mxu1 %v1566_v33  ;;  %1078 = vmatmul.mubr.f32.gmra.mrb[18].mxu0 %v1571_v38 }
  0x90   :  { %582 = vmatprep.mubr.f32.mxu1 %v1399_v7  ;;  %1083 = vmatprep.mubr.f32.mxu0 %v1399_v7 }
  0x93   :  { %585 = vmatmul.mubr.f32.gmra.mrb[18].mxu1 %v1583_v45  ;;  %1085 = vmatmul.mubr.f32.gmra.mrb[20].mxu0 %v1578_v40  ;;  %v1140_v45 = vlaneseq }
  0x94   :  { %590 = vmatprep.mubr.f32.mxu1 %v1399_v7  ;;  %1090 = vmatprep.mubr.f32.mxu0 %v1399_v7 }
  0x95   :  { %v1141_v63 = vshrl.u32 %v1140_v45, 7 }
  0x97   :  { %593 = vmatmul.mubr.f32.gmra.mrb[20].mxu1 %v1589_v47  ;;  %1092 = vmatmul.mubr.f32.gmra.mrb[22].mxu0 %v1593_v52 }
  0x98   :  { %598 = vmatprep.mubr.f32.mxu1 %v1399_v7 }
  0x9b   :  { %601 = vmatmul.mubr.f32.gmra.mrb[22].mxu1 %v1600_v57 }
 0x13e   :  { %v1016_v17 = vpop.f32.mrb[0].mxu0 }
 0x13f   :  { %v1018_v18 = vpop.f32.mrb[1].mxu0 }
 0x142   :  { %v514_v19 = vpop.f32.mrb[0].mxu1  ;;  %v1023_v20 = vpop.f32.mrb[2].mxu0 }
 0x143   :  { %v1252_v21 = vadd.f32 %v1016_v17, %v514_v19  ;;  %v516_v26 = vpop.f32.mrb[1].mxu1  ;;  %v1025_v27 = vpop.f32.mrb[3].mxu0 }
 0x144   :  { %v1253_v29 = vadd.f32 %v1018_v18, %v516_v26 }
 0x145   :  { %v1098_v32 = vmul.f32 %v1252_v21, %v1252_v21 }
 0x146   :  { %v522_v43 = vpop.f32.mrb[2].mxu1  ;;  %v1030_v51 = vpop.f32.mrb[4].mxu0  ;;  %v1099_v16 = vmul.f32 %v1253_v29, %v1253_v29 }
 0x147   :  { %v1254_v56 = vadd.f32 %v1023_v20, %v522_v43  ;;  %v524_v58 = vpop.f32.mrb[3].mxu1  ;;  %v1032_v61 = vpop.f32.mrb[5].mxu0  ;;  %v1142_v43 = vsub.s32 0, %v1141_v63 }
 0x148   :  { %v1255_v62 = vadd.f32 %v1025_v27, %v524_v58 }
 0x149   :  { %v1100_v42 = vmul.f32 %v1254_v56, %v1254_v56 }
 0x14a   :  { %v530_v2 = vpop.f32.mrb[4].mxu1  ;;  %v1037_v5 = vpop.f32.mrb[6].mxu0  ;;  %v1101_v46 = vmul.f32 %v1255_v62, %v1255_v62  ;;  %v1146_v62 = vsub.s32 1, %v1141_v63 }
 0x14b   :  { %v1256_v6 = vadd.f32 %v1030_v51, %v530_v2  ;;  %v532_v7 = vpop.f32.mrb[5].mxu1  ;;  %v1039_v8 = vpop.f32.mrb[7].mxu0 }
 0x14c   :  { %v1257_v9 = vadd.f32 %v1032_v61, %v532_v7  ;;  %v1138_v61 = vld [vmem:[%s1759_s2] sm:$0x3]  ;;  %s1401_s2 = smov [#allocation2]  }
 0x14d   :  { %v1102_v59 = vmul.f32 %v1256_v6, %v1256_v6  ;;  %s1220_s17 = sshll.u32 %s1401_s2, 4  ;;  %s1221_s17 = int_to_ptr.vmem [resolvable:$true] %s1220_s17 }
 0x14e   :  { %v538_v10 = vpop.f32.mrb[6].mxu1  ;;  %v1044_v11 = vpop.f32.mrb[8].mxu0  ;;  %v1103_v0 = vmul.f32 %v1257_v9, %v1257_v9  ;;  %s1375_s18 = scalar_lea.vmem %s1221_s17, 256  ;;  %p1380_p1 = scmp.lt.s32.totalorder %s1221_s17, %s1221_s17 }
 0x14f   :  { %v1258_v12 = vadd.f32 %v1037_v5, %v538_v10  ;;  %v540_v13 = vpop.f32.mrb[7].mxu1  ;;  %v1046_v14 = vpop.f32.mrb[9].mxu0  ;;  %p1376_p0 = scmp.ne.s32.totalorder %s1221_s17, %s1375_s18  ;;  %p1381_p2 = scmp.lt.s32.totalorder %s1375_s18, %s1375_s18 }
 0x150   :  { %v1259_v22 = vadd.f32 %v1039_v8, %v540_v13 }
 0x151   :  { %v1104_v27 = vmul.f32 %v1258_v12, %v1258_v12  ;;  %v1143_v12 = vrot.slane %v1138_v61, %v1142_v43  ;;  %p1382_p3 = por %p1381_p2, %p1380_p1 }
 0x152   :  { %v546_v23 = vpop.f32.mrb[8].mxu1  ;;  %v1051_v24 = vpop.f32.mrb[10].mxu0  ;;  %v1105_v51 = vmul.f32 %v1259_v22, %v1259_v22 }
 0x153   :  { %v1260_v25 = vadd.f32 %v1044_v11, %v546_v23  ;;  %v548_v28 = vpop.f32.mrb[9].mxu1  ;;  %v1053_v30 = vpop.f32.mrb[11].mxu0  ;;  %p1383_p4 = pnand %p1382_p3, %p1376_p0 }
 0x154   :  { %v1261_v31 = vadd.f32 %v1046_v14, %v548_v28  ;;  %v1720_v14 = vrot.slane %v1138_v61, %v1146_v62 }
 0x155   :  { %v1106_v15 = vmul.f32 %v1260_v25, %v1260_v25 }
 0x156   :  { %v1107_v33 = vmul.f32 %v1261_v31, %v1261_v31  ;;  %v554_v34 = vpop.f32.mrb[10].mxu1  ;;  %v1058_v35 = vpop.f32.mrb[12].mxu0 }
 0x157   :  { %v1122_v36 = vadd.f32 %v1106_v15, %v1098_v32  ;;  %v1262_v37 = vadd.f32 %v1051_v24, %v554_v34  ;;  %v556_v38 = vpop.f32.mrb[11].mxu1  ;;  %v1060_v39 = vpop.f32.mrb[13].mxu0 }
 0x158   :  { %v1123_v40 = vadd.f32 %v1107_v33, %v1099_v16  ;;  %v1263_v41 = vadd.f32 %v1053_v30, %v556_v38 }
 0x159   :  { %v1108_v44 = vmul.f32 %v1262_v37, %v1262_v37 }
 0x15a   :  { %v1109_v47 = vmul.f32 %v1263_v41, %v1263_v41  ;;  %v562_v48 = vpop.f32.mrb[12].mxu1  ;;  %v1065_v49 = vpop.f32.mrb[14].mxu0 }
 0x15b   :  { %v1124_v50 = vadd.f32 %v1108_v44, %v1100_v42  ;;  %v1264_v52 = vadd.f32 %v1058_v35, %v562_v48  ;;  %v564_v53 = vpop.f32.mrb[13].mxu1  ;;  %v1067_v54 = vpop.f32.mrb[15].mxu0  ;;  %v1400_v44 = vmov 0  }
 0x15c   :  { %v1125_v55 = vadd.f32 %v1109_v47, %v1101_v46  ;;  %v1265_v57 = vadd.f32 %v1060_v39, %v564_v53 }
 0x15d   :  { %v1110_v60 = vmul.f32 %v1264_v52, %v1264_v52 }
 0x15e   :  { %v1111_v1 = vmul.f32 %v1265_v57, %v1265_v57  ;;  %v570_v3 = vpop.f32.mrb[14].mxu1  ;;  %v1072_v4 = vpop.f32.mrb[16].mxu0 }
 0x15f   :  { %v1711_v17 = vadd.f32 %v1110_v60, %v1102_v59  ;;  %v1266_v18 = vadd.f32 %v1065_v49, %v570_v3  ;;  %v572_v19 = vpop.f32.mrb[15].mxu1  ;;  %v1074_v20 = vpop.f32.mrb[17].mxu0 }
 0x160   :  { %v1713_v21 = vadd.f32 %v1111_v1, %v1103_v0  ;;  %v1267_v26 = vadd.f32 %v1067_v54, %v572_v19 }
 0x161   :  { %v1112_v29 = vmul.f32 %v1266_v18, %v1266_v18 }
 0x162   :  { %v1113_v56 = vmul.f32 %v1267_v26, %v1267_v26  ;;  %v578_v58 = vpop.f32.mrb[16].mxu1  ;;  %v1079_v2 = vpop.f32.mrb[18].mxu0 }
 0x163   :  { %v1128_v5 = vadd.f32 %v1112_v29, %v1104_v27  ;;  %v1268_v6 = vadd.f32 %v1072_v4, %v578_v58  ;;  %v580_v7 = vpop.f32.mrb[17].mxu1  ;;  %v1081_v8 = vpop.f32.mrb[19].mxu0 }
 0x164   :  { %v1718_v9 = vadd.f32 %v1113_v56, %v1105_v51  ;;  %v1269_v10 = vadd.f32 %v1074_v20, %v580_v7 }
 0x165   :  { %v1114_v11 = vmul.f32 %v1268_v6, %v1268_v6 }
 0x166   :  { %v1115_v13 = vmul.f32 %v1269_v10, %v1269_v10  ;;  %v586_v22 = vpop.f32.mrb[18].mxu1  ;;  %v1086_v23 = vpop.f32.mrb[20].mxu0 }
 0x167   :  { %v1130_v24 = vadd.f32 %v1122_v36, %v1114_v11  ;;  %v1270_v25 = vadd.f32 %v1079_v2, %v586_v22  ;;  %v588_v28 = vpop.f32.mrb[19].mxu1  ;;  %v1088_v30 = vpop.f32.mrb[21].mxu0 }
 0x168   :  { %v1131_v31 = vadd.f32 %v1123_v40, %v1115_v13  ;;  %v1271_v32 = vadd.f32 %v1081_v8, %v588_v28 }
 0x169   :  { %v1150_v15 = vadd.f32 %v1143_v12, %v1130_v24  ;;  %v1116_v16 = vmul.f32 %v1270_v25, %v1270_v25 }
 0x16a   :  { %v1151_v33 = vadd.f32 %v1720_v14, %v1131_v31  ;;  %v1117_v34 = vmul.f32 %v1271_v32, %v1271_v32  ;;  %v594_v35 = vpop.f32.mrb[20].mxu1  ;;  %v1093_v37 = vpop.f32.mrb[22].mxu0 }
 0x16b   :  { %vm1158_vm1 = vcmp.lt.f32.partialorder %v1150_v15, 4.0  ;;  %vm1174_vm2 = vcmp.lt.f32.partialorder %v1150_v15, 16.0  ;;  %v1132_v38 = vadd.f32 %v1124_v50, %v1116_v16  ;;  %v1272_v39 = vadd.f32 %v1086_v23, %v594_v35  ;;  %v596_v41 = vpop.f32.mrb[21].mxu1  ;;  %v1095_v42 = vpop.f32.mrb[23].mxu0 }
 0x16c   :  { %v1182_v36 = vsel %vm1174_vm2, 1, %v1400_v44  ;;  %vm1159_vm3 = vcmp.lt.f32.partialorder %v1151_v33, 4.0  ;;  %vm1175_vm4 = vcmp.lt.f32.partialorder %v1151_v33, 16.0  ;;  %v1166_v45 = vsel %vm1158_vm1, 1, %v1400_v44 }
 0x16d   :  { %v1152_v40 = vadd.f32 %v1143_v12, %v1132_v38  ;;  %v1133_v46 = vadd.f32 %v1125_v55, %v1117_v34  ;;  %v1118_v47 = vmul.f32 %v1272_v39, %v1272_v39  ;;  %v1273_v48 = vadd.f32 %v1088_v30, %v596_v41 }
 0x16e   :  { %v602_v49 = vpop.f32.mrb[22].mxu1  ;;  %v1190_v52 = vmul.u32 2, %v1182_v36  ;;  %v1167_v53 = vsel %vm1159_vm3, 1, %v1400_v44  ;;  %v1183_v57 = vsel %vm1175_vm4, 1, %v1400_v44 }
 0x16f   :  { %vm1176_vm5 = vcmp.lt.f32.partialorder %v1152_v40, 16.0  ;;  %v1274_v50 = vadd.f32 %v1093_v37, %v602_v49  ;;  %v604_v54 = vpop.f32.mrb[23].mxu1  ;;  %v1153_v60 = vadd.f32 %v1720_v14, %v1133_v46  ;;  %v1134_v63 = vadd.f32 %v1711_v17, %v1118_v47 }
 0x170   :  { %v1184_v59 = vsel %vm1176_vm5, 1, %v1400_v44  ;;  %vm1160_vm6 = vcmp.lt.f32.partialorder %v1152_v40, 4.0  ;;  %v1119_v0 = vmul.f32 %v1273_v48, %v1273_v48  ;;  %v1275_v1 = vadd.f32 %v1095_v42, %v604_v54 }
 0x171   :  { %v1120_v55 = vmul.f32 %v1274_v50, %v1274_v50  ;;  %v1192_v3 = vmul.u32 2, %v1184_v59  ;;  %vm1161_vm7 = vcmp.lt.f32.partialorder %v1153_v60, 4.0  ;;  %vm1177_vm8 = vcmp.lt.f32.partialorder %v1153_v60, 16.0 }
 0x172   :  { %v1154_v4 = vadd.f32 %v1143_v12, %v1134_v63  ;;  %v1191_v18 = vmul.u32 2, %v1183_v57  ;;  %v1185_v19 = vsel %vm1177_vm8, 1, %v1400_v44  ;;  %v1135_v20 = vadd.f32 %v1713_v21, %v1119_v0 }
 0x173   :  { %v1136_v26 = vadd.f32 %v1128_v5, %v1120_v55  ;;  %v1168_v27 = vsel %vm1160_vm6, 1, %v1400_v44  ;;  %v1193_v29 = vmul.u32 2, %v1185_v19  ;;  %v1121_v43 = vmul.f32 %v1275_v1, %v1275_v1 }
 0x174   :  { %vm1178_vm9 = vcmp.lt.f32.partialorder %v1154_v4, 16.0  ;;  %v1169_v17 = vsel %vm1161_vm7, 1, %v1400_v44  ;;  %v1155_v56 = vadd.f32 %v1720_v14, %v1135_v20  ;;  %vm1162_vm10 = vcmp.lt.f32.partialorder %v1154_v4, 4.0 }
 0x175   :  { %v1186_v51 = vsel %vm1178_vm9, 1, %v1400_v44  ;;  %v1156_v58 = vadd.f32 %v1143_v12, %v1136_v26  ;;  %v1137_v61 = vadd.f32 %v1718_v9, %v1121_v43  ;;  %v1200_v62 = vadd.s32 %v1192_v3, %v1168_v27 }
 0x176   :  { %v1201_v2 = vadd.s32 %v1193_v29, %v1169_v17  ;;  %v1194_v6 = vmul.u32 2, %v1186_v51  ;;  %vm1179_vm11 = vcmp.lt.f32.partialorder %v1155_v56, 16.0  ;;  %v1198_v7 = vadd.s32 %v1190_v52, %v1166_v45 }
 0x177   :  { %vm1164_vm12 = vcmp.lt.f32.partialorder %v1156_v58, 4.0  ;;  %vm1180_vm13 = vcmp.lt.f32.partialorder %v1156_v58, 16.0  ;;  %v1187_v21 = vsel %vm1179_vm11, 1, %v1400_v44  ;;  %v1199_v8 = vadd.s32 %v1191_v18, %v1167_v53 }
 0x178   :  { %v1188_v5 = vsel %vm1180_vm13, 1, %v1400_v44  ;;  %v1170_v10 = vsel %vm1162_vm10, 1, %v1400_v44  ;;  %vm1163_vm14 = vcmp.lt.f32.partialorder %v1155_v56, 4.0  ;;  %v1157_v12 = vadd.f32 %v1720_v14, %v1137_v61 }
 0x179   :  { %v1196_v11 = vmul.u32 2, %v1188_v5  ;;  %v1195_v13 = vmul.u32 2, %v1187_v21  ;;  %v1172_v9 = vsel %vm1164_vm12, 1, %v1400_v44  ;;  %v1206_v22 = vpack.c.b16 %v1200_v62, %v1198_v7 }
 0x17a   :  { %v1209_v23 = vpack.c.b16 %v1201_v2, %v1199_v8  ;;  %vm1165_vm15 = vcmp.lt.f32.partialorder %v1157_v12, 4.0  ;;  %vm1181_vm0 = vcmp.lt.f32.partialorder %v1157_v12, 16.0  ;;  %v1202_v24 = vadd.s32 %v1194_v6, %v1170_v10 }
 0x17b   :  { %v1204_v25 = vadd.s32 %v1196_v11, %v1172_v9  ;;  %v1189_v28 = vsel %vm1181_vm0, 1, %v1400_v44  ;;  %v1171_v32 = vsel %vm1163_vm14, 1, %v1400_v44  ;;  %v1173_v15 = vsel %vm1165_vm15, 1, %v1400_v44 }
 0x17c   :  { %v1197_v30 = vmul.u32 2, %v1189_v28  ;;  %v1203_v16 = vadd.s32 %v1195_v13, %v1171_v32 }
 0x17d   :  { %v1207_v31 = vpack.c.b16 %v1204_v25, %v1202_v24 }
 0x17e   :  { %v1205_v33 = vadd.s32 %v1197_v30, %v1173_v15 }
 0x17f   :  { %v1208_v14 = vpack.c.b8 %v1207_v31, %v1206_v22 }
 0x180   :  { %v1210_v34 = vpack.c.b16 %v1205_v33, %v1203_v16 }
 0x181   :  { %1212 = vst [vmem:[#allocation2] sm:$0xff] %v1208_v14 }
 0x182   :  { %v1211_v35 = vpack.c.b8 %v1210_v34, %v1209_v23 }
 0x184   :  { %1213 = vst [vmem:[#allocation2 + $0x8] sm:$0xff] %v1211_v35 }
 0x185   :  { %1386 = shalt.err (!%p1383_p4)
}
 0x186   :  { %s1387_s21 = scalar_lea.hbm %s1760_s3, 256 }
 0x187   :  { %p1388_p5 = scmp.ne.s32.totalorder %s1760_s3, %s1387_s21  ;;  %p1391_p6 = scmp.lt.u32.totalorder %s1387_s21, %s1760_s3 }
 0x189   :  { %p1393_p7 = pnand %p1391_p6, %p1388_p5 }
 0x18b   :  { %1396 = shalt.err (!%p1393_p7)
}
 0x18c   :  { %1223 = dma.vmem_to_hbm [thread:$0]  %s1221_s17, 256, %s1760_s3, [#allocation3]  }
 0x18d   :  { %1397 = dma.done.wait [#allocation3], 256  }
 0x18e   :  { %1398 = vsyncadd [#allocation3], 4294967040 }
 0x18f   :  { %1227 = vsyncpa [#allocation3], 1 }

</bundles_post_ra>
